<compile_context>
chip_gen: v7x
topology: tpu7x:2x2x1
jax: 0.10.0
libtpu: 0.0.40
codegen_flags: <defaults>
</compile_context>

<pallas_src>
import jax
import jax.numpy as jnp
from jax.experimental import pallas as pl
from jax.experimental.pallas import tpu as pltpu

EPS = 1e-5


# ---------------------------------------------------------------------------
# Kernels
# ---------------------------------------------------------------------------
def phi_bn_kernel(g_ref, w_ref, gamma_ref, beta_ref, out_ref):
    """phi: 1x1 conv-transpose + training-mode BN, in (Cin, Rg) lane-dense form.

    Conv bias omitted: exactly cancelled by the BN mean subtraction.
    """
    z = jnp.dot(w_ref[...], g_ref[...], preferred_element_type=jnp.float32)
    mean = jnp.mean(z, axis=1, keepdims=True)
    var = jnp.mean(jnp.square(z - mean), axis=1, keepdims=True)   # biased var
    scale = gamma_ref[...] * jax.lax.rsqrt(var + EPS)
    out_ref[...] = z * scale + (beta_ref[...] - scale * mean)     # single FMA


def resize_matmul_kernel(a_ref, m_ref, out_ref):
    """One axis of the separable bilinear resize: (rows, S_in) @ (S_in, S_out)."""
    out_ref[...] = jnp.dot(a_ref[...], m_ref[...],
                           preferred_element_type=jnp.float32)


def theta_stats_kernel(x_ref, wt_ref, sum_ref, sq_ref):
    """Accumulate per-channel sum / sum-of-squares of theta(x) = W_t @ x."""
    @pl.when(pl.program_id(0) == 0)
    def _():
        sum_ref[...] = jnp.zeros_like(sum_ref)
        sq_ref[...] = jnp.zeros_like(sq_ref)

    z = jnp.dot(wt_ref[...], x_ref[...], preferred_element_type=jnp.float32)
    sum_ref[...] += jnp.sum(z, axis=1, keepdims=True)
    sq_ref[...] += jnp.sum(z * z, axis=1, keepdims=True)


def psi_stats_kernel(x_ref, gl_ref, wt_ref, wp_ref, at_ref, bt_ref,
                     sum_ref, sq_ref):
    """Accumulate per-channel sum / sumsq of psi-conv(relu(theta_bn + gl))."""
    @pl.when(pl.program_id(0) == 0)
    def _():
        sum_ref[...] = jnp.zeros_like(sum_ref)
        sq_ref[...] = jnp.zeros_like(sq_ref)

    z = jnp.dot(wt_ref[...], x_ref[...], preferred_element_type=jnp.float32)
    s = jnp.maximum(z * at_ref[...] + bt_ref[...] + gl_ref[...], 0.0)   # ReLU
    zp = jnp.dot(wp_ref[...], s, preferred_element_type=jnp.float32)
    sum_ref[...] += jnp.sum(zp, axis=1, keepdims=True)
    sq_ref[...] += jnp.sum(zp * zp, axis=1, keepdims=True)


def gate_kernel(x_ref, gl_ref, wt_ref, wp_ref, at_ref, bt_ref, ap_ref, bp_ref,
                y_ref):
    """Finalize (embarrassingly lane-parallel): theta_bn, relu-add, psi_bn,
    sigmoid, gating multiply."""
    x = x_ref[...]
    z = jnp.dot(wt_ref[...], x, preferred_element_type=jnp.float32)
    s = jnp.maximum(z * at_ref[...] + bt_ref[...] + gl_ref[...], 0.0)
    zp = jnp.dot(wp_ref[...], s, preferred_element_type=jnp.float32)
    psi = jax.nn.sigmoid(zp * ap_ref[...] + bp_ref[...])
    y_ref[...] = x * psi


# ---------------------------------------------------------------------------
# Small helpers (wrapper side)
# ---------------------------------------------------------------------------
def _single(kernel, out_shape, *args):
    """Single-invocation pallas_call: whole (small) arrays resident in VMEM."""
    return pl.pallas_call(kernel, out_shape=out_shape)(*args)


def _lane_tile(r):
    """Largest lane tile <= 1024 that evenly divides r (keeps stats exact)."""
    for t in (1024, 512, 256, 128):
        if r % t == 0:
            return t
    return r


def _bn_fold(s1, s2, count, gamma, beta):
    """(sum, sumsq) -> per-channel (scale, shift) for y = scale * z + shift."""
    mean = s1 / count
    var = jnp.maximum(s2 / count - mean * mean, 0.0)          # biased variance
    scale = gamma * jax.lax.rsqrt(var + EPS)
    return scale, beta - scale * mean


def bilinear_matrix(out_size, in_size):
    """PyTorch F.upsample(mode='bilinear', align_corners=False) weights."""
    scale = in_size / out_size
    i = jnp.arange(out_size, dtype=jnp.float32)
    src = jnp.clip((i + 0.5) * scale - 0.5, 0.0, float(in_size - 1))
    i0 = jnp.floor(src).astype(jnp.int32)
    i1 = jnp.minimum(i0 + 1, in_size - 1)
    w1 = src - i0.astype(jnp.float32)
    rows = jnp.arange(out_size)
    A = jnp.zeros((out_size, in_size), jnp.float32)
    A = A.at[rows, i0].add(1.0 - w1)
    A = A.at[rows, i1].add(w1)
    return A


# ---------------------------------------------------------------------------
# Forward pass
# ---------------------------------------------------------------------------
def attention_block_forward(x, g, params):
    N, Cin, H, W = x.shape
    _, Cg, Hg, Wg = g.shape
    R = N * H * W

    # Layout plumbing (wrapper only): channels on sublanes, big axis on lanes.
    # x_cr columns are flattened (n, h, w); g_cr columns are (n, wg, hg) so the
    # two resize matmuls need only free reshapes plus one small transpose.
    x_cr = jnp.transpose(x, (1, 0, 2, 3)).reshape(Cin, R)
    g_cr = jnp.transpose(g, (1, 0, 3, 2)).reshape(Cg, N * Wg * Hg)

    # ---- gating branch (gating resolution, small) ---------------------------
    p = _single(phi_bn_kernel,
                jax.ShapeDtypeStruct((Cin, N * Wg * Hg), jnp.float32),
                g_cr, params["w_phi"], params["g_phi"], params["be_phi"])

    a_h_t = bilinear_matrix(H, Hg).T          # (Hg, H)
    a_w_t = bilinear_matrix(W, Wg).T          # (Wg, W)

    # H-axis resize: rows = (Cin, N, Wg), contract Hg.
    t_h = _single(resize_matmul_kernel,
                  jax.ShapeDtypeStruct((Cin * N * Wg, H), jnp.float32),
                  p.reshape(Cin * N * Wg, Hg), a_h_t)
    # One small transpose (gating-W x full-H) to put Wg minor for the W resize.
    t_h = jnp.transpose(t_h.reshape(Cin * N, Wg, H), (0, 2, 1))
    # W-axis resize: rows = (Cin, N, H), contract Wg.
    gl = _single(resize_matmul_kernel,
                 jax.ShapeDtypeStruct((Cin * N * H, W), jnp.float32),
                 t_h.reshape(Cin * N * H, Wg), a_w_t)
    gl = gl.reshape(Cin, R)                   # free reshape; matches x_cr layout

    # ---- main branch (full resolution, lane-tiled) ---------------------------
    tr = _lane_tile(R)
    grid = (R // tr,)
    _tile_map = lambda t: (0, t)              # lane-tiled blocks
    _bcast_map = lambda t: (0, 0)             # small resident operands
    big_spec = pl.BlockSpec((Cin, tr), _tile_map)
    w_spec = pl.BlockSpec((Cin, Cin), _bcast_map)
    c_spec = pl.BlockSpec((Cin, 1), _bcast_map)
    stat_shape = jax.ShapeDtypeStruct((Cin, 1), jnp.float32)

    # M1: theta conv + global per-channel stats (accumulate over lane tiles).
    ts1, ts2 = pl.pallas_call(
        theta_stats_kernel,
        grid=grid,
        in_specs=[big_spec, w_spec],
        out_specs=(c_spec, c_spec),
        out_shape=(stat_shape, stat_shape),
        compiler_params=pltpu.CompilerParams(
            dimension_semantics=("arbitrary",)),
    )(x_cr, params["w_theta"])
    a_t, b_t = _bn_fold(ts1, ts2, R, params["g_theta"], params["be_theta"])

    # M2: psi conv on relu(theta_bn + gl) + global per-channel stats.
    ps1, ps2 = pl.pallas_call(
        psi_stats_kernel,
        grid=grid,
        in_specs=[big_spec, big_spec, w_spec, w_spec, c_spec, c_spec],
        out_specs=(c_spec, c_spec),
        out_shape=(stat_shape, stat_shape),
        compiler_params=pltpu.CompilerParams(
            dimension_semantics=("arbitrary",)),
    )(x_cr, gl, params["w_theta"], params["w_psi"], a_t, b_t)
    a_p, b_p = _bn_fold(ps1, ps2, R, params["g_psi"], params["be_psi"])

    # M3: normalize psi, sigmoid, gate.  Fully parallel over lane tiles.
    cost = pl.CostEstimate(
        flops=int(4 * Cin * Cin * R + 8 * Cin * R),
        transcendentals=int(Cin * R),
        bytes_accessed=int(4 * (3 * Cin * R + 2 * Cin * Cin + 4 * Cin)))
    y_cr = pl.pallas_call(
        gate_kernel,
        grid=grid,
        in_specs=[big_spec, big_spec, w_spec, w_spec,
                  c_spec, c_spec, c_spec, c_spec],
        out_specs=big_spec,
        out_shape=jax.ShapeDtypeStruct((Cin, R), jnp.float32),
        compiler_params=pltpu.CompilerParams(
            dimension_semantics=("parallel",)),
        cost_estimate=cost,
    )(x_cr, gl, params["w_theta"], params["w_psi"], a_t, b_t, a_p, b_p)

    # Layout plumbing back to NCHW.
    return jnp.transpose(y_cr.reshape(Cin, N, H, W), (1, 0, 2, 3))


# ---------------------------------------------------------------------------
# Deterministic synthetic parameters (shapes from Attention_block.__init__).
# Conv biases are omitted on purpose: training-mode BN subtracts the batch
# mean, which cancels the 1x1-conv bias exactly.
# ---------------------------------------------------------------------------
def init_params(cin, cg, key):
    ks = jax.random.split(key, 9)
    n = lambda k, shape, s: s * jax.random.normal(k, shape, jnp.float32)
    return dict(
        # theta: Conv2d(cin, cin, 1) + BN(cin)
        w_theta=n(ks[0], (cin, cin), 0.3),
        g_theta=1.0 + n(ks[1], (cin, 1), 0.1),
        be_theta=n(ks[2], (cin, 1), 0.1),
        # phi: ConvTranspose2d(cg, cin, 1) + BN(cin)   (weight in apply layout)
        w_phi=n(ks[3], (cin, cg), 0.3),
        g_phi=1.0 + n(ks[4], (cin, 1), 0.1),
        be_phi=n(ks[5], (cin, 1), 0.1),
        # psi: Conv2d(cin, cin, 1) + BN(cin) + Sigmoid  (matches the spec module)
        w_psi=n(ks[6], (cin, cin), 0.3),
        g_psi=1.0 + n(ks[7], (cin, 1), 0.1),
        be_psi=n(ks[8], (cin, 1), 0.1),
    )


# ---------------------------------------------------------------------------
# Pure-JAX reference of the same forward pass (for a numerical smoke check).
# ---------------------------------------------------------------------------
def _reference_forward(x, g, params):
    N, Cin, H, W = x.shape
    _, Cg, Hg, Wg = g.shape

    def bn(z, gamma, beta):   # training-mode BN over (N, H, W), biased var
        mean = jnp.mean(z, axis=(0, 2, 3), keepdims=True)
        var = jnp.mean(jnp.square(z - mean), axis=(0, 2, 3), keepdims=True)
        return (gamma.reshape(1, -1, 1, 1) * (z - mean) * jax.lax.rsqrt(var + EPS)
                + beta.reshape(1, -1, 1, 1))

    xl = bn(jnp.einsum("oi,nihw->nohw", params["w_theta"], x),
            params["g_theta"], params["be_theta"])
    gl = bn(jnp.einsum("oc,nchw->nohw", params["w_phi"], g),
            params["g_phi"], params["be_phi"])
    A_h = bilinear_matrix(H, Hg)
    A_w = bilinear_matrix(W, Wg)
    gl = jnp.einsum("Hh,nohw,Ww->noHW", A_h, gl, A_w)
    s = jnp.maximum(xl + gl, 0.0)
    psi = jax.nn.sigmoid(bn(jnp.einsum("oi,nihw->nohw", params["w_psi"], s),
                            params["g_psi"], params["be_psi"]))
    return x * psi


if __name__ == "__main__":
    N, Cin, Cg = 2, 4, 8
    H = W = 16          # x spatial
    Hg = Wg = 8         # gating spatial (upsampled to x spatial inside forward)

    key = jax.random.PRNGKey(0)
    kx, kg, kp = jax.random.split(key, 3)
    x = jax.random.normal(kx, (N, Cin, H, W), jnp.float32)
    g = jax.random.normal(kg, (N, Cg, Hg, Wg), jnp.float32)
    params = init_params(Cin, Cg, kp)

    fwd = jax.jit(attention_block_forward)
    y = fwd(x, g, params)
    jax.block_until_ready(y)
    assert y.shape == (N, Cin, H, W) and y.dtype == jnp.float32

    # Numerical smoke check against the plain-JAX reference.
    y_ref = _reference_forward(x, g, params)
    assert float(jnp.max(jnp.abs(y - y_ref))) < 1e-2

    print("KERNEL_OK")
</pallas_src>

<mosaic_0001>
module attributes {stable_mosaic.version = 11 : i64} {
  func.func private @main(%arg0: i32) attributes {dimension_semantics = [#tpu.dimension_semantics<core_parallel>], iteration_bounds = array<i64: 2>, tpu.core_type = #tpu.core_type<sc_scalar_subcore>, window_params = []} {
    return
  }
}

module attributes {stable_mosaic.version = 11 : i64} {
  func.func private @main(%arg0: i32) attributes {dimension_semantics = [#tpu.dimension_semantics<core_parallel>], iteration_bounds = array<i64: 2>, tpu.core_type = #tpu.core_type<sc_scalar_subcore>, window_params = []} {
    return
  }
}

module attributes {stable_mosaic.version = 11 : i64} {
  func.func @phi_bn_kernel(%arg0: memref<8x128xf32, #tpu.memory_space<vmem>>, %arg1: memref<4x8xf32, #tpu.memory_space<vmem>>, %arg2: memref<4x1xf32, #tpu.memory_space<vmem>>, %arg3: memref<4x1xf32, #tpu.memory_space<vmem>>, %arg4: memref<4x128xf32, #tpu.memory_space<vmem>>) attributes {dimension_semantics = [], scalar_prefetch = 0 : i64, scratch_operands = 0 : i64, tpu.core_type = #tpu.core_type<tc>} {
    %c0 = arith.constant 0 : index
    %c0_0 = arith.constant 0 : index
    %0 = vector.load %arg1[%c0, %c0_0] : memref<4x8xf32, #tpu.memory_space<vmem>>, vector<4x8xf32>
    %c0_1 = arith.constant 0 : index
    %c0_2 = arith.constant 0 : index
    %1 = vector.load %arg0[%c0_1, %c0_2] : memref<8x128xf32, #tpu.memory_space<vmem>>, vector<8x128xf32>
    %cst = arith.constant dense<0.000000e+00> : vector<4x128xf32>
    %2 = tpu.matmul %0, %1, %cst {dimension_numbers = #tpu.dot_dimension_numbers<[1], [0], [0], [1], [0, 0, 1, 1], [], []>} : vector<4x8xf32>, vector<8x128xf32>, vector<4x128xf32> -> vector<4x128xf32>
    %cst_3 = arith.constant dense<0.000000e+00> : vector<4xf32>
    %3 = vector.multi_reduction <add>, %2, %cst_3 [1] : vector<4x128xf32> to vector<4xf32>
    %4 = vector.shape_cast %3 : vector<4xf32> to vector<4x1xf32>
    %cst_4 = arith.constant 1.280000e+02 : f32
    %5 = vector.broadcast %cst_4 : f32 to vector<4x1xf32>
    %6 = arith.divf %4, %5 : vector<4x1xf32>
    %7 = vector.broadcast %6 : vector<4x1xf32> to vector<4x128xf32>
    %8 = arith.subf %2, %7 : vector<4x128xf32>
    %9 = arith.mulf %8, %8 : vector<4x128xf32>
    %cst_5 = arith.constant dense<0.000000e+00> : vector<4xf32>
    %10 = vector.multi_reduction <add>, %9, %cst_5 [1] : vector<4x128xf32> to vector<4xf32>
    %11 = vector.shape_cast %10 : vector<4xf32> to vector<4x1xf32>
    %cst_6 = arith.constant 1.280000e+02 : f32
    %12 = vector.broadcast %cst_6 : f32 to vector<4x1xf32>
    %13 = arith.divf %11, %12 : vector<4x1xf32>
    %c0_7 = arith.constant 0 : index
    %c0_8 = arith.constant 0 : index
    %14 = vector.load %arg2[%c0_7, %c0_8] : memref<4x1xf32, #tpu.memory_space<vmem>>, vector<4x1xf32>
    %cst_9 = arith.constant 9.99999974E-6 : f32
    %15 = vector.broadcast %cst_9 : f32 to vector<4x1xf32>
    %16 = arith.addf %13, %15 : vector<4x1xf32>
    %17 = math.rsqrt %16 : vector<4x1xf32>
    %18 = arith.mulf %14, %17 : vector<4x1xf32>
    %19 = vector.broadcast %18 : vector<4x1xf32> to vector<4x128xf32>
    %20 = arith.mulf %2, %19 : vector<4x128xf32>
    %c0_10 = arith.constant 0 : index
    %c0_11 = arith.constant 0 : index
    %21 = vector.load %arg3[%c0_10, %c0_11] : memref<4x1xf32, #tpu.memory_space<vmem>>, vector<4x1xf32>
    %22 = arith.mulf %18, %6 : vector<4x1xf32>
    %23 = arith.subf %21, %22 : vector<4x1xf32>
    %24 = vector.broadcast %23 : vector<4x1xf32> to vector<4x128xf32>
    %25 = arith.addf %20, %24 : vector<4x128xf32>
    %c0_12 = arith.constant 0 : index
    %c0_13 = arith.constant 0 : index
    %26 = vector.load %arg4[%c0_12, %c0_13] : memref<4x128xf32, #tpu.memory_space<vmem>>, vector<4x128xf32>
    tpu.vector_store %arg4[%c0_12, %c0_13], %25 {strides = array<i32>} : memref<4x128xf32, #tpu.memory_space<vmem>>, vector<4x128xf32>,
    return
  }
}

module attributes {stable_mosaic.version = 11 : i64} {
  func.func @theta_stats_kernel(%arg0: i32, %arg1: memref<4x512xf32, #tpu.memory_space<vmem>>, %arg2: memref<4x4xf32, #tpu.memory_space<vmem>>, %arg3: memref<4x1xf32, #tpu.memory_space<vmem>>, %arg4: memref<4x1xf32, #tpu.memory_space<vmem>>) attributes {dimension_semantics = [#tpu.dimension_semantics<arbitrary>], iteration_bounds = array<i64: 1>, scalar_prefetch = 0 : i64, scratch_operands = 0 : i64, tpu.core_type = #tpu.core_type<tc>, window_params = [{transform_indices = @transform_0, window_bounds = array<i64: 4, 512>}, {pipeline_mode = #tpu.pipeline_mode<synchronous>, transform_indices = @transform_1, window_bounds = array<i64: 4, 4>}, {pipeline_mode = #tpu.pipeline_mode<synchronous>, transform_indices = @transform_2, window_bounds = array<i64: 4, 1>}, {pipeline_mode = #tpu.pipeline_mode<synchronous>, transform_indices = @transform_3, window_bounds = array<i64: 4, 1>}]} {
    %c0_i32 = arith.constant 0 : i32
    %0 = arith.cmpi eq, %arg0, %c0_i32 : i32
    %1 = arith.extui %0 : i1 to i32
    %c0_i32_0 = arith.constant 0 : i32
    %2 = arith.cmpi ne, %1, %c0_i32_0 : i32
    scf.if %2 {
      %cst_14 = arith.constant 0.000000e+00 : f32
      %17 = vector.broadcast %cst_14 : f32 to vector<4x1xf32>
      %c0_15 = arith.constant 0 : index
      %c0_16 = arith.constant 0 : index
      %18 = vector.load %arg3[%c0_15, %c0_16] : memref<4x1xf32, #tpu.memory_space<vmem>>, vector<4x1xf32>
      tpu.vector_store %arg3[%c0_15, %c0_16], %17 {strides = array<i32>} : memref<4x1xf32, #tpu.memory_space<vmem>>, vector<4x1xf32>,
      %cst_17 = arith.constant 0.000000e+00 : f32
      %19 = vector.broadcast %cst_17 : f32 to vector<4x1xf32>
      %c0_18 = arith.constant 0 : index
      %c0_19 = arith.constant 0 : index
      %20 = vector.load %arg4[%c0_18, %c0_19] : memref<4x1xf32, #tpu.memory_space<vmem>>, vector<4x1xf32>
      tpu.vector_store %arg4[%c0_18, %c0_19], %19 {strides = array<i32>} : memref<4x1xf32, #tpu.memory_space<vmem>>, vector<4x1xf32>,
    } else {
    }
    %c0 = arith.constant 0 : index
    %c0_1 = arith.constant 0 : index
    %3 = vector.load %arg2[%c0, %c0_1] : memref<4x4xf32, #tpu.memory_space<vmem>>, vector<4x4xf32>
    %c0_2 = arith.constant 0 : index
    %c0_3 = arith.constant 0 : index
    %4 = vector.load %arg1[%c0_2, %c0_3] : memref<4x512xf32, #tpu.memory_space<vmem>>, vector<4x512xf32>
    %cst = arith.constant dense<0.000000e+00> : vector<4x512xf32>
    %5 = tpu.matmul %3, %4, %cst {dimension_numbers = #tpu.dot_dimension_numbers<[1], [0], [0], [1], [0, 0, 1, 1], [], []>} : vector<4x4xf32>, vector<4x512xf32>, vector<4x512xf32> -> vector<4x512xf32>
    %c0_4 = arith.constant 0 : index
    %c0_5 = arith.constant 0 : index
    %6 = vector.load %arg3[%c0_4, %c0_5] : memref<4x1xf32, #tpu.memory_space<vmem>>, vector<4x1xf32>
    %cst_6 = arith.constant dense<0.000000e+00> : vector<4xf32>
    %7 = vector.multi_reduction <add>, %5, %cst_6 [1] : vector<4x512xf32> to vector<4xf32>
    %8 = vector.shape_cast %7 : vector<4xf32> to vector<4x1xf32>
    %9 = arith.addf %6, %8 : vector<4x1xf32>
    %c0_7 = arith.constant 0 : index
    %c0_8 = arith.constant 0 : index
    %10 = vector.load %arg3[%c0_7, %c0_8] : memref<4x1xf32, #tpu.memory_space<vmem>>, vector<4x1xf32>
    tpu.vector_store %arg3[%c0_7, %c0_8], %9 {strides = array<i32>} : memref<4x1xf32, #tpu.memory_space<vmem>>, vector<4x1xf32>,
    %c0_9 = arith.constant 0 : index
    %c0_10 = arith.constant 0 : index
    %11 = vector.load %arg4[%c0_9, %c0_10] : memref<4x1xf32, #tpu.memory_space<vmem>>, vector<4x1xf32>
    %12 = arith.mulf %5, %5 : vector<4x512xf32>
    %cst_11 = arith.constant dense<0.000000e+00> : vector<4xf32>
    %13 = vector.multi_reduction <add>, %12, %cst_11 [1] : vector<4x512xf32> to vector<4xf32>
    %14 = vector.shape_cast %13 : vector<4xf32> to vector<4x1xf32>
    %15 = arith.addf %11, %14 : vector<4x1xf32>
    %c0_12 = arith.constant 0 : index
    %c0_13 = arith.constant 0 : index
    %16 = vector.load %arg4[%c0_12, %c0_13] : memref<4x1xf32, #tpu.memory_space<vmem>>, vector<4x1xf32>
    tpu.vector_store %arg4[%c0_12, %c0_13], %15 {strides = array<i32>} : memref<4x1xf32, #tpu.memory_space<vmem>>, vector<4x1xf32>,
    return
  }
  func.func @transform_0(%arg0: i32) -> (i32, i32) {
    %c0_i32 = arith.constant 0 : i32
    %c0_i32_0 = arith.constant 0 : i32
    return %c0_i32, %arg0 : i32, i32
  }
  func.func @transform_1(%arg0: i32) -> (i32, i32) {
    %c0_i32 = arith.constant 0 : i32
    %c0_i32_0 = arith.constant 0 : i32
    %c0_i32_1 = arith.constant 0 : i32
    return %c0_i32, %c0_i32_0 : i32, i32
  }
  func.func @transform_2(%arg0: i32) -> (i32, i32) {
    %c0_i32 = arith.constant 0 : i32
    %c0_i32_0 = arith.constant 0 : i32
    %c0_i32_1 = arith.constant 0 : i32
    return %c0_i32, %c0_i32_0 : i32, i32
  }
  func.func @transform_3(%arg0: i32) -> (i32, i32) {
    %c0_i32 = arith.constant 0 : i32
    %c0_i32_0 = arith.constant 0 : i32
    %c0_i32_1 = arith.constant 0 : i32
    return %c0_i32, %c0_i32_0 : i32, i32
  }
}

module attributes {stable_mosaic.version = 11 : i64} {
  func.func @resize_matmul_kernel(%arg0: memref<64x8xf32, #tpu.memory_space<vmem>>, %arg1: memref<8x16xf32, #tpu.memory_space<vmem>>, %arg2: memref<64x16xf32, #tpu.memory_space<vmem>>) attributes {dimension_semantics = [], scalar_prefetch = 0 : i64, scratch_operands = 0 : i64, tpu.core_type = #tpu.core_type<tc>} {
    %c0 = arith.constant 0 : index
    %c0_0 = arith.constant 0 : index
    %0 = vector.load %arg0[%c0, %c0_0] : memref<64x8xf32, #tpu.memory_space<vmem>>, vector<64x8xf32>
    %c0_1 = arith.constant 0 : index
    %c0_2 = arith.constant 0 : index
    %1 = vector.load %arg1[%c0_1, %c0_2] : memref<8x16xf32, #tpu.memory_space<vmem>>, vector<8x16xf32>
    %cst = arith.constant dense<0.000000e+00> : vector<64x16xf32>
    %2 = tpu.matmul %0, %1, %cst {dimension_numbers = #tpu.dot_dimension_numbers<[1], [0], [0], [1], [0, 0, 1, 1], [], []>} : vector<64x8xf32>, vector<8x16xf32>, vector<64x16xf32> -> vector<64x16xf32>
    %c0_3 = arith.constant 0 : index
    %c0_4 = arith.constant 0 : index
    %3 = vector.load %arg2[%c0_3, %c0_4] : memref<64x16xf32, #tpu.memory_space<vmem>>, vector<64x16xf32>
    tpu.vector_store %arg2[%c0_3, %c0_4], %2 {strides = array<i32>} : memref<64x16xf32, #tpu.memory_space<vmem>>, vector<64x16xf32>,
    return
  }
}

module attributes {stable_mosaic.version = 11 : i64} {
  func.func @resize_matmul_kernel(%arg0: memref<128x8xf32, #tpu.memory_space<vmem>>, %arg1: memref<8x16xf32, #tpu.memory_space<vmem>>, %arg2: memref<128x16xf32, #tpu.memory_space<vmem>>) attributes {dimension_semantics = [], scalar_prefetch = 0 : i64, scratch_operands = 0 : i64, tpu.core_type = #tpu.core_type<tc>} {
    %c0 = arith.constant 0 : index
    %c0_0 = arith.constant 0 : index
    %0 = vector.load %arg0[%c0, %c0_0] : memref<128x8xf32, #tpu.memory_space<vmem>>, vector<128x8xf32>
    %c0_1 = arith.constant 0 : index
    %c0_2 = arith.constant 0 : index
    %1 = vector.load %arg1[%c0_1, %c0_2] : memref<8x16xf32, #tpu.memory_space<vmem>>, vector<8x16xf32>
    %cst = arith.constant dense<0.000000e+00> : vector<128x16xf32>
    %2 = tpu.matmul %0, %1, %cst {dimension_numbers = #tpu.dot_dimension_numbers<[1], [0], [0], [1], [0, 0, 1, 1], [], []>} : vector<128x8xf32>, vector<8x16xf32>, vector<128x16xf32> -> vector<128x16xf32>
    %c0_3 = arith.constant 0 : index
    %c0_4 = arith.constant 0 : index
    %3 = vector.load %arg2[%c0_3, %c0_4] : memref<128x16xf32, #tpu.memory_space<vmem>>, vector<128x16xf32>
    tpu.vector_store %arg2[%c0_3, %c0_4], %2 {strides = array<i32>} : memref<128x16xf32, #tpu.memory_space<vmem>>, vector<128x16xf32>,
    return
  }
}

module attributes {stable_mosaic.version = 11 : i64} {
  func.func @psi_stats_kernel(%arg0: i32, %arg1: memref<4x512xf32, #tpu.memory_space<vmem>>, %arg2: memref<4x512xf32, #tpu.memory_space<vmem>>, %arg3: memref<4x4xf32, #tpu.memory_space<vmem>>, %arg4: memref<4x4xf32, #tpu.memory_space<vmem>>, %arg5: memref<4x1xf32, #tpu.memory_space<vmem>>, %arg6: memref<4x1xf32, #tpu.memory_space<vmem>>, %arg7: memref<4x1xf32, #tpu.memory_space<vmem>>, %arg8: memref<4x1xf32, #tpu.memory_space<vmem>>) attributes {dimension_semantics = [#tpu.dimension_semantics<arbitrary>], iteration_bounds = array<i64: 1>, scalar_prefetch = 0 : i64, scratch_operands = 0 : i64, tpu.core_type = #tpu.core_type<tc>, window_params = [{transform_indices = @transform_0, window_bounds = array<i64: 4, 512>}, {transform_indices = @transform_1, window_bounds = array<i64: 4, 512>}, {pipeline_mode = #tpu.pipeline_mode<synchronous>, transform_indices = @transform_2, window_bounds = array<i64: 4, 4>}, {pipeline_mode = #tpu.pipeline_mode<synchronous>, transform_indices = @transform_3, window_bounds = array<i64: 4, 4>}, {pipeline_mode = #tpu.pipeline_mode<synchronous>, transform_indices = @transform_4, window_bounds = array<i64: 4, 1>}, {pipeline_mode = #tpu.pipeline_mode<synchronous>, transform_indices = @transform_5, window_bounds = array<i64: 4, 1>}, {pipeline_mode = #tpu.pipeline_mode<synchronous>, transform_indices = @transform_6, window_bounds = array<i64: 4, 1>}, {pipeline_mode = #tpu.pipeline_mode<synchronous>, transform_indices = @transform_7, window_bounds = array<i64: 4, 1>}]} {
    %c0_i32 = arith.constant 0 : i32
    %0 = arith.cmpi eq, %arg0, %c0_i32 : i32
    %1 = arith.extui %0 : i1 to i32
    %c0_i32_0 = arith.constant 0 : i32
    %2 = arith.cmpi ne, %1, %c0_i32_0 : i32
    scf.if %2 {
      %cst_24 = arith.constant 0.000000e+00 : f32
      %29 = vector.broadcast %cst_24 : f32 to vector<4x1xf32>
      %c0_25 = arith.constant 0 : index
      %c0_26 = arith.constant 0 : index
      %30 = vector.load %arg7[%c0_25, %c0_26] : memref<4x1xf32, #tpu.memory_space<vmem>>, vector<4x1xf32>
      tpu.vector_store %arg7[%c0_25, %c0_26], %29 {strides = array<i32>} : memref<4x1xf32, #tpu.memory_space<vmem>>, vector<4x1xf32>,
      %cst_27 = arith.constant 0.000000e+00 : f32
      %31 = vector.broadcast %cst_27 : f32 to vector<4x1xf32>
      %c0_28 = arith.constant 0 : index
      %c0_29 = arith.constant 0 : index
      %32 = vector.load %arg8[%c0_28, %c0_29] : memref<4x1xf32, #tpu.memory_space<vmem>>, vector<4x1xf32>
      tpu.vector_store %arg8[%c0_28, %c0_29], %31 {strides = array<i32>} : memref<4x1xf32, #tpu.memory_space<vmem>>, vector<4x1xf32>,
    } else {
    }
    %c0 = arith.constant 0 : index
    %c0_1 = arith.constant 0 : index
    %3 = vector.load %arg3[%c0, %c0_1] : memref<4x4xf32, #tpu.memory_space<vmem>>, vector<4x4xf32>
    %c0_2 = arith.constant 0 : index
    %c0_3 = arith.constant 0 : index
    %4 = vector.load %arg1[%c0_2, %c0_3] : memref<4x512xf32, #tpu.memory_space<vmem>>, vector<4x512xf32>
    %cst = arith.constant dense<0.000000e+00> : vector<4x512xf32>
    %5 = tpu.matmul %3, %4, %cst {dimension_numbers = #tpu.dot_dimension_numbers<[1], [0], [0], [1], [0, 0, 1, 1], [], []>} : vector<4x4xf32>, vector<4x512xf32>, vector<4x512xf32> -> vector<4x512xf32>
    %c0_4 = arith.constant 0 : index
    %c0_5 = arith.constant 0 : index
    %6 = vector.load %arg5[%c0_4, %c0_5] : memref<4x1xf32, #tpu.memory_space<vmem>>, vector<4x1xf32>
    %7 = vector.broadcast %6 : vector<4x1xf32> to vector<4x512xf32>
    %8 = arith.mulf %5, %7 : vector<4x512xf32>
    %c0_6 = arith.constant 0 : index
    %c0_7 = arith.constant 0 : index
    %9 = vector.load %arg6[%c0_6, %c0_7] : memref<4x1xf32, #tpu.memory_space<vmem>>, vector<4x1xf32>
    %10 = vector.broadcast %9 : vector<4x1xf32> to vector<4x512xf32>
    %11 = arith.addf %8, %10 : vector<4x512xf32>
    %c0_8 = arith.constant 0 : index
    %c0_9 = arith.constant 0 : index
    %12 = vector.load %arg2[%c0_8, %c0_9] : memref<4x512xf32, #tpu.memory_space<vmem>>, vector<4x512xf32>
    %13 = arith.addf %11, %12 : vector<4x512xf32>
    %cst_10 = arith.constant 0.000000e+00 : f32
    %14 = vector.broadcast %cst_10 : f32 to vector<4x512xf32>
    %15 = arith.maximumf %13, %14 : vector<4x512xf32>
    %c0_11 = arith.constant 0 : index
    %c0_12 = arith.constant 0 : index
    %16 = vector.load %arg4[%c0_11, %c0_12] : memref<4x4xf32, #tpu.memory_space<vmem>>, vector<4x4xf32>
    %cst_13 = arith.constant dense<0.000000e+00> : vector<4x512xf32>
    %17 = tpu.matmul %16, %15, %cst_13 {dimension_numbers = #tpu.dot_dimension_numbers<[1], [0], [0], [1], [0, 0, 1, 1], [], []>} : vector<4x4xf32>, vector<4x512xf32>, vector<4x512xf32> -> vector<4x512xf32>
    %c0_14 = arith.constant 0 : index
    %c0_15 = arith.constant 0 : index
    %18 = vector.load %arg7[%c0_14, %c0_15] : memref<4x1xf32, #tpu.memory_space<vmem>>, vector<4x1xf32>
    %cst_16 = arith.constant dense<0.000000e+00> : vector<4xf32>
    %19 = vector.multi_reduction <add>, %17, %cst_16 [1] : vector<4x512xf32> to vector<4xf32>
    %20 = vector.shape_cast %19 : vector<4xf32> to vector<4x1xf32>
    %21 = arith.addf %18, %20 : vector<4x1xf32>
    %c0_17 = arith.constant 0 : index
    %c0_18 = arith.constant 0 : index
    %22 = vector.load %arg7[%c0_17, %c0_18] : memref<4x1xf32, #tpu.memory_space<vmem>>, vector<4x1xf32>
    tpu.vector_store %arg7[%c0_17, %c0_18], %21 {strides = array<i32>} : memref<4x1xf32, #tpu.memory_space<vmem>>, vector<4x1xf32>,
    %c0_19 = arith.constant 0 : index
    %c0_20 = arith.constant 0 : index
    %23 = vector.load %arg8[%c0_19, %c0_20] : memref<4x1xf32, #tpu.memory_space<vmem>>, vector<4x1xf32>
    %24 = arith.mulf %17, %17 : vector<4x512xf32>
    %cst_21 = arith.constant dense<0.000000e+00> : vector<4xf32>
    %25 = vector.multi_reduction <add>, %24, %cst_21 [1] : vector<4x512xf32> to vector<4xf32>
    %26 = vector.shape_cast %25 : vector<4xf32> to vector<4x1xf32>
    %27 = arith.addf %23, %26 : vector<4x1xf32>
    %c0_22 = arith.constant 0 : index
    %c0_23 = arith.constant 0 : index
    %28 = vector.load %arg8[%c0_22, %c0_23] : memref<4x1xf32, #tpu.memory_space<vmem>>, vector<4x1xf32>
    tpu.vector_store %arg8[%c0_22, %c0_23], %27 {strides = array<i32>} : memref<4x1xf32, #tpu.memory_space<vmem>>, vector<4x1xf32>,
    return
  }
  func.func @transform_0(%arg0: i32) -> (i32, i32) {
    %c0_i32 = arith.constant 0 : i32
    %c0_i32_0 = arith.constant 0 : i32
    return %c0_i32, %arg0 : i32, i32
  }
  func.func @transform_1(%arg0: i32) -> (i32, i32) {
    %c0_i32 = arith.constant 0 : i32
    %c0_i32_0 = arith.constant 0 : i32
    return %c0_i32, %arg0 : i32, i32
  }
  func.func @transform_2(%arg0: i32) -> (i32, i32) {
    %c0_i32 = arith.constant 0 : i32
    %c0_i32_0 = arith.constant 0 : i32
    %c0_i32_1 = arith.constant 0 : i32
    return %c0_i32, %c0_i32_0 : i32, i32
  }
  func.func @transform_3(%arg0: i32) -> (i32, i32) {
    %c0_i32 = arith.constant 0 : i32
    %c0_i32_0 = arith.constant 0 : i32
    %c0_i32_1 = arith.constant 0 : i32
    return %c0_i32, %c0_i32_0 : i32, i32
  }
  func.func @transform_4(%arg0: i32) -> (i32, i32) {
    %c0_i32 = arith.constant 0 : i32
    %c0_i32_0 = arith.constant 0 : i32
    %c0_i32_1 = arith.constant 0 : i32
    return %c0_i32, %c0_i32_0 : i32, i32
  }
  func.func @transform_5(%arg0: i32) -> (i32, i32) {
    %c0_i32 = arith.constant 0 : i32
    %c0_i32_0 = arith.constant 0 : i32
    %c0_i32_1 = arith.constant 0 : i32
    return %c0_i32, %c0_i32_0 : i32, i32
  }
  func.func @transform_6(%arg0: i32) -> (i32, i32) {
    %c0_i32 = arith.constant 0 : i32
    %c0_i32_0 = arith.constant 0 : i32
    %c0_i32_1 = arith.constant 0 : i32
    return %c0_i32, %c0_i32_0 : i32, i32
  }
  func.func @transform_7(%arg0: i32) -> (i32, i32) {
    %c0_i32 = arith.constant 0 : i32
    %c0_i32_0 = arith.constant 0 : i32
    %c0_i32_1 = arith.constant 0 : i32
    return %c0_i32, %c0_i32_0 : i32, i32
  }
}

module attributes {stable_mosaic.version = 11 : i64} {
  func.func @gate_kernel(%arg0: i32, %arg1: memref<4x512xf32, #tpu.memory_space<vmem>>, %arg2: memref<4x512xf32, #tpu.memory_space<vmem>>, %arg3: memref<4x4xf32, #tpu.memory_space<vmem>>, %arg4: memref<4x4xf32, #tpu.memory_space<vmem>>, %arg5: memref<4x1xf32, #tpu.memory_space<vmem>>, %arg6: memref<4x1xf32, #tpu.memory_space<vmem>>, %arg7: memref<4x1xf32, #tpu.memory_space<vmem>>, %arg8: memref<4x1xf32, #tpu.memory_space<vmem>>, %arg9: memref<4x512xf32, #tpu.memory_space<vmem>>) attributes {dimension_semantics = [#tpu.dimension_semantics<parallel>], iteration_bounds = array<i64: 1>, scalar_prefetch = 0 : i64, scratch_operands = 0 : i64, tpu.core_type = #tpu.core_type<tc>, window_params = [{transform_indices = @transform_0, window_bounds = array<i64: 4, 512>}, {transform_indices = @transform_1, window_bounds = array<i64: 4, 512>}, {pipeline_mode = #tpu.pipeline_mode<synchronous>, transform_indices = @transform_2, window_bounds = array<i64: 4, 4>}, {pipeline_mode = #tpu.pipeline_mode<synchronous>, transform_indices = @transform_3, window_bounds = array<i64: 4, 4>}, {pipeline_mode = #tpu.pipeline_mode<synchronous>, transform_indices = @transform_4, window_bounds = array<i64: 4, 1>}, {pipeline_mode = #tpu.pipeline_mode<synchronous>, transform_indices = @transform_5, window_bounds = array<i64: 4, 1>}, {pipeline_mode = #tpu.pipeline_mode<synchronous>, transform_indices = @transform_6, window_bounds = array<i64: 4, 1>}, {pipeline_mode = #tpu.pipeline_mode<synchronous>, transform_indices = @transform_7, window_bounds = array<i64: 4, 1>}, {transform_indices = @transform_8, window_bounds = array<i64: 4, 512>}]} {
    %c0 = arith.constant 0 : index
    %c0_0 = arith.constant 0 : index
    %0 = vector.load %arg1[%c0, %c0_0] : memref<4x512xf32, #tpu.memory_space<vmem>>, vector<4x512xf32>
    %c0_1 = arith.constant 0 : index
    %c0_2 = arith.constant 0 : index
    %1 = vector.load %arg3[%c0_1, %c0_2] : memref<4x4xf32, #tpu.memory_space<vmem>>, vector<4x4xf32>
    %cst = arith.constant dense<0.000000e+00> : vector<4x512xf32>
    %2 = tpu.matmul %1, %0, %cst {dimension_numbers = #tpu.dot_dimension_numbers<[1], [0], [0], [1], [0, 0, 1, 1], [], []>} : vector<4x4xf32>, vector<4x512xf32>, vector<4x512xf32> -> vector<4x512xf32>
    %c0_3 = arith.constant 0 : index
    %c0_4 = arith.constant 0 : index
    %3 = vector.load %arg5[%c0_3, %c0_4] : memref<4x1xf32, #tpu.memory_space<vmem>>, vector<4x1xf32>
    %4 = vector.broadcast %3 : vector<4x1xf32> to vector<4x512xf32>
    %5 = arith.mulf %2, %4 : vector<4x512xf32>
    %c0_5 = arith.constant 0 : index
    %c0_6 = arith.constant 0 : index
    %6 = vector.load %arg6[%c0_5, %c0_6] : memref<4x1xf32, #tpu.memory_space<vmem>>, vector<4x1xf32>
    %7 = vector.broadcast %6 : vector<4x1xf32> to vector<4x512xf32>
    %8 = arith.addf %5, %7 : vector<4x512xf32>
    %c0_7 = arith.constant 0 : index
    %c0_8 = arith.constant 0 : index
    %9 = vector.load %arg2[%c0_7, %c0_8] : memref<4x512xf32, #tpu.memory_space<vmem>>, vector<4x512xf32>
    %10 = arith.addf %8, %9 : vector<4x512xf32>
    %cst_9 = arith.constant 0.000000e+00 : f32
    %11 = vector.broadcast %cst_9 : f32 to vector<4x512xf32>
    %12 = arith.maximumf %10, %11 : vector<4x512xf32>
    %c0_10 = arith.constant 0 : index
    %c0_11 = arith.constant 0 : index
    %13 = vector.load %arg4[%c0_10, %c0_11] : memref<4x4xf32, #tpu.memory_space<vmem>>, vector<4x4xf32>
    %cst_12 = arith.constant dense<0.000000e+00> : vector<4x512xf32>
    %14 = tpu.matmul %13, %12, %cst_12 {dimension_numbers = #tpu.dot_dimension_numbers<[1], [0], [0], [1], [0, 0, 1, 1], [], []>} : vector<4x4xf32>, vector<4x512xf32>, vector<4x512xf32> -> vector<4x512xf32>
    %c0_13 = arith.constant 0 : index
    %c0_14 = arith.constant 0 : index
    %15 = vector.load %arg7[%c0_13, %c0_14] : memref<4x1xf32, #tpu.memory_space<vmem>>, vector<4x1xf32>
    %16 = vector.broadcast %15 : vector<4x1xf32> to vector<4x512xf32>
    %17 = arith.mulf %14, %16 : vector<4x512xf32>
    %c0_15 = arith.constant 0 : index
    %c0_16 = arith.constant 0 : index
    %18 = vector.load %arg8[%c0_15, %c0_16] : memref<4x1xf32, #tpu.memory_space<vmem>>, vector<4x1xf32>
    %19 = vector.broadcast %18 : vector<4x1xf32> to vector<4x512xf32>
    %20 = arith.addf %17, %19 : vector<4x512xf32>
    %21 = arith.negf %20 : vector<4x512xf32>
    %22 = math.exp %21 : vector<4x512xf32>
    %cst_17 = arith.constant 1.000000e+00 : f32
    %23 = vector.broadcast %cst_17 : f32 to vector<4x512xf32>
    %24 = arith.addf %23, %22 : vector<4x512xf32>
    %25 = arith.divf %23, %24 : vector<4x512xf32>
    %26 = arith.mulf %0, %25 : vector<4x512xf32>
    %c0_18 = arith.constant 0 : index
    %c0_19 = arith.constant 0 : index
    %27 = vector.load %arg9[%c0_18, %c0_19] : memref<4x512xf32, #tpu.memory_space<vmem>>, vector<4x512xf32>
    tpu.vector_store %arg9[%c0_18, %c0_19], %26 {strides = array<i32>} : memref<4x512xf32, #tpu.memory_space<vmem>>, vector<4x512xf32>,
    return
  }
  func.func @transform_0(%arg0: i32) -> (i32, i32) {
    %c0_i32 = arith.constant 0 : i32
    %c0_i32_0 = arith.constant 0 : i32
    return %c0_i32, %arg0 : i32, i32
  }
  func.func @transform_1(%arg0: i32) -> (i32, i32) {
    %c0_i32 = arith.constant 0 : i32
    %c0_i32_0 = arith.constant 0 : i32
    return %c0_i32, %arg0 : i32, i32
  }
  func.func @transform_2(%arg0: i32) -> (i32, i32) {
    %c0_i32 = arith.constant 0 : i32
    %c0_i32_0 = arith.constant 0 : i32
    %c0_i32_1 = arith.constant 0 : i32
    return %c0_i32, %c0_i32_0 : i32, i32
  }
  func.func @transform_3(%arg0: i32) -> (i32, i32) {
    %c0_i32 = arith.constant 0 : i32
    %c0_i32_0 = arith.constant 0 : i32
    %c0_i32_1 = arith.constant 0 : i32
    return %c0_i32, %c0_i32_0 : i32, i32
  }
  func.func @transform_4(%arg0: i32) -> (i32, i32) {
    %c0_i32 = arith.constant 0 : i32
    %c0_i32_0 = arith.constant 0 : i32
    %c0_i32_1 = arith.constant 0 : i32
    return %c0_i32, %c0_i32_0 : i32, i32
  }
  func.func @transform_5(%arg0: i32) -> (i32, i32) {
    %c0_i32 = arith.constant 0 : i32
    %c0_i32_0 = arith.constant 0 : i32
    %c0_i32_1 = arith.constant 0 : i32
    return %c0_i32, %c0_i32_0 : i32, i32
  }
  func.func @transform_6(%arg0: i32) -> (i32, i32) {
    %c0_i32 = arith.constant 0 : i32
    %c0_i32_0 = arith.constant 0 : i32
    %c0_i32_1 = arith.constant 0 : i32
    return %c0_i32, %c0_i32_0 : i32, i32
  }
  func.func @transform_7(%arg0: i32) -> (i32, i32) {
    %c0_i32 = arith.constant 0 : i32
    %c0_i32_0 = arith.constant 0 : i32
    %c0_i32_1 = arith.constant 0 : i32
    return %c0_i32, %c0_i32_0 : i32, i32
  }
  func.func @transform_8(%arg0: i32) -> (i32, i32) {
    %c0_i32 = arith.constant 0 : i32
    %c0_i32_0 = arith.constant 0 : i32
    return %c0_i32, %arg0 : i32, i32
  }
}

</mosaic_0001>

<bundles_post_ra>
// kernel: attention_block_forward.6
= control target key start
LH: loop header
LB: loop body
LE: loop exit
PB: predicated region body
PF: predicated region fallthrough
CT: control target
= control target key end

     0   :  { %vm19_vm0 = vcmask 64512   ;;  %v144_v0 = vmov 0.0   ;;  %vm145_vm1 = vmmov 0   ;;  %vm93_vm2 = vcmask 1043456   ;;  %s187_s0 = inlined_call_operand.vmem [shape: f32[8,128], index: 0, kind: input, shape index: {}]   ;;  %s188_s1 = inlined_call_operand.vmem [shape: f32[4,8], index: 1, kind: input, shape index: {}]   ;;  %s189_s2 = inlined_call_operand.vmem [shape: f32[4,1], index: 2, kind: input, shape index: {}]   ;;  %s190_s3 = inlined_call_operand.vmem [shape: f32[4,1], index: 3, kind: input, shape index: {}]   ;;  %s191_s4 = inlined_call_operand.vmem [shape: f32[4,128], index: 4, kind: output, shape index: {}]  }
   0x1   :  { %132 = vmatprep.subr.mxu0 %v144_v0  ;;  %v18_v1 = vld [vmem:[%s187_s0] sm:$0xff]  ;;  %134 = vmatprep.mubr.msk.f32.mxu0 %vm145_vm1, %v144_v0  ;;  %v146_v11 = vmov 0  }
   0x2   :  { %v17_v2 = vld [vmem:[%s188_s1] sm:$0xf]  ;;  %133 = vmatpush3.msra.mxu0 %v18_v1  ;;  %140 = vset.pattern.permute.xlu1 %v146_v11 }
   0x3   :  { %135 = vmatmul.mubr.msk.f32.vlgmr.msra.gmra.mrb[0].mxu0 %vm19_vm0, %v17_v2  ;;  %141 = vset.pattern.permute.xlu0 %v146_v11  ;;  %v105_v15 = vld [vmem:[%s189_s2] sm:$0xf] }
   0x4   :  { %v115_v18 = vld [vmem:[%s190_s3] sm:$0xf] }
  0xd6   :  { %v89_v3 = vpop.f32.mrb[0].mxu0 }
  0xd7   :  { %v136_v4 = vpop.f32.mrb[1].mxu0  ;;  %v94_v5 = vsel %vm93_vm2, %v89_v3, 0.0 }
  0xd8   :  { %95 = vadd.xlane.f32.xlu0 %v94_v5 }
 0x165   :  { %v96_v6 = vpop.xlane.xlu0 %95 }
 0x166   :  { %v98_v7 = vmul.f32 0.0078125, %v96_v6 }
 0x168   :  { %v99_v8 = vsub.f32 %v89_v3, %v98_v7 }
 0x16a   :  { %v100_v9 = vmul.f32 %v99_v8, %v99_v8 }
 0x16c   :  { %v101_v10 = vsel %vm93_vm2, %v100_v9, 0.0 }
 0x16d   :  { %102 = vadd.xlane.f32.xlu0 %v101_v10 }
 0x1fa   :  { %v103_v12 = vpop.xlane.xlu0 %102 }
 0x1fb   :  { %v104_v13 = vmul.f32 0.0078125, %v103_v12 }
 0x1fd   :  { %v106_v14 = vadd.f32 1e-05, %v104_v13 }
 0x1ff   :  { %142 = vrsqrt.f32 %v106_v14 }
 0x209   :  { %v143_v16 = vpop.eup %142 }
 0x20a   :  { %v108_v17 = vmul.f32 %v143_v16, %v105_v15 }
 0x20c   :  { %111 = vperm.xlu1 %140, %v108_v17   ;;  %v116_v19 = vmul.f32 %v108_v17, %v98_v7 }
 0x20e   :  { %v117_v20 = vsub.f32 %v115_v18, %v116_v19 }
 0x210   :  { %120 = vperm.xlu1 %140, %v117_v20  }
 0x28b   :  { %v112_v21 = vpop.permute.xlu1 %111 }
 0x28c   :  { %v114_v22 = vmul.f32 %v112_v21, %v89_v3 }
 0x28f   :  { %v121_v23 = vpop.permute.xlu1 %120 }
 0x290   :  { %v123_v24 = vadd.f32 %v121_v23, %v114_v22 }
 0x292   :  { %124 = vst [vmem:[%s191_s4] sm:$0xf] %v123_v24 }

// kernel: attention_block_forward.9
= control target key start
LH: loop header
LB: loop body
LE: loop exit
PB: predicated region body
PF: predicated region fallthrough
CT: control target
= control target key end

     0   :  { %vm31_vm0 = vcmask 1043456   ;;  %v228_v1 = vmov 0.0   ;;  %vm27_vm1 = vcmask 31744   ;;  %vm17_vm2 = vcmask 3072   ;;  %s292_s0 = inlined_call_operand.vmem [shape: f32[4,512], index: 0, kind: input, shape index: {}]   ;;  %s293_s1 = inlined_call_operand.vmem [shape: f32[4,4], index: 1, kind: input, shape index: {}]   ;;  %s294_s2 = inlined_call_operand.vmem [shape: f32[4,1], index: 2, kind: output, shape index: {0}]   ;;  %s295_s3 = inlined_call_operand.vmem [shape: f32[4,1], index: 3, kind: output, shape index: {1}]  }
   0x1   :  { %v21_v0 = vld [vmem:[%s292_s0] sm:$0xff]  ;;  %104 = vmatprep.mubr.f32.mxu0 %v228_v1  ;;  %v22_v2 = vld [vmem:[%s292_s0 + $0x8] sm:$0xff]  ;;  %175 = vmatprep.mubr.f32.mxu1 %v228_v1  ;;  %18 = vst.msk [vmem:[%s294_s2] sm:$0xf] %vm17_vm2, %v228_v1  ;;  %19 = vst.msk [vmem:[%s295_s3] sm:$0xf] %vm17_vm2, %v228_v1 }
   0x2   :  { %v25_v3 = vcombine.high %v21_v0, %v21_v0  ;;  %v26_v4 = vcombine.high %v22_v2, %v22_v2  ;;  %v20_v5 = vld [vmem:[%s293_s1] sm:$0xf] }
   0x4   :  { %219 = vmatprep.subr.msk.mxu0 %vm31_vm0, %v25_v3  ;;  %222 = vmatprep.subr.msk.mxu1 %vm31_vm0, %v26_v4 }
   0x5   :  { %220 = vmatpush1.msk.msra.mxu0 %vm31_vm0, %v21_v0  ;;  %223 = vmatpush1.msk.msra.mxu1 %vm31_vm0, %v22_v2 }
   0x6   :  { %221 = vmatmul.mubr.msk.f32.vlgmr.msra.gmra.mrb[0].mxu0 %vm27_vm1, %v20_v5  ;;  %224 = vmatmul.mubr.msk.f32.vlgmr.msra.gmra.mrb[0].mxu1 %vm27_vm1, %v20_v5 }
   0x8   :  { %v182_v28 = vld [vmem:[%s294_s2] sm:$0xf] }
   0x9   :  { %v195_v31 = vld [vmem:[%s295_s3] sm:$0xf] }
  0xd9   :  { %v106_v6 = vpop.f32.mrb[0].mxu0  ;;  %v177_v7 = vpop.f32.mrb[0].mxu1 }
  0xda   :  { %v183_v8 = vsel %vm31_vm0, %v106_v6, 0.0  ;;  %v196_v9 = vmul.f32 %v106_v6, %v106_v6  ;;  %v108_v10 = vpop.f32.mrb[1].mxu0  ;;  %v198_v11 = vmul.f32 %v177_v7, %v177_v7  ;;  %v179_v12 = vpop.f32.mrb[1].mxu1  ;;  %v186_v15 = vsel %vm31_vm0, %v177_v7, 0.0 }
  0xdb   :  { %v184_v13 = vsel %vm31_vm0, %v108_v10, 0.0  ;;  %v197_v14 = vmul.f32 %v108_v10, %v108_v10  ;;  %v199_v20 = vmul.f32 %v179_v12, %v179_v12  ;;  %v188_v23 = vsel %vm31_vm0, %v179_v12, 0.0 }
  0xdc   :  { %v200_v16 = vsel %vm31_vm0, %v196_v9, 0.0  ;;  %v185_v17 = vadd.f32 %v184_v13, %v183_v8  ;;  %v203_v19 = vsel %vm31_vm0, %v198_v11, 0.0 }
  0xdd   :  { %v201_v18 = vsel %vm31_vm0, %v197_v14, 0.0  ;;  %v205_v26 = vsel %vm31_vm0, %v199_v20, 0.0 }
  0xde   :  { %v202_v21 = vadd.f32 %v201_v18, %v200_v16  ;;  %v187_v22 = vadd.f32 %v186_v15, %v185_v17 }
  0xe0   :  { %v189_v24 = vadd.f32 %v188_v23, %v187_v22  ;;  %v204_v25 = vadd.f32 %v203_v19, %v202_v21 }
  0xe2   :  { %190 = vadd.xlane.f32.xlu0 %v189_v24  ;;  %v206_v27 = vadd.f32 %v205_v26, %v204_v25 }
  0xe6   :  { %207 = vadd.xlane.f32.xlu0 %v206_v27 }
 0x16f   :  { %v191_v29 = vpop.xlane.xlu0 %190 }
 0x170   :  { %v192_v30 = vadd.f32 %v191_v29, %v182_v28 }
 0x172   :  { %194 = vst.msk [vmem:[%s294_s2] sm:$0xf] %vm17_vm2, %v192_v30 }
 0x173   :  { %v208_v32 = vpop.xlane.xlu0 %207 }
 0x174   :  { %v209_v33 = vadd.f32 %v208_v32, %v195_v31 }
 0x176   :  { %210 = vst.msk [vmem:[%s295_s3] sm:$0xf] %vm17_vm2, %v209_v33 }

// kernel: attention_block_forward.7
= control target key start
LH: loop header
LB: loop body
LE: loop exit
PB: predicated region body
PF: predicated region fallthrough
CT: control target
= control target key end

     0   :  { %7 = vsyncpa [#allocation3], 0  ;;  %s234_s9 = smov [#allocation2]   ;;  %s326_s0 = inlined_call_operand.vmem [shape: f32[64,8], index: 0, kind: input, shape index: {}]   ;;  %s327_s1 = inlined_call_operand.hbm [shape: f32[8,16], index: 1, kind: input, shape index: {}]   ;;  %s328_s2 = inlined_call_operand.vmem [shape: f32[64,16], index: 2, kind: output, shape index: {}]  }
   0x1   :  { %s16_s10 = sshll.u32 %s234_s9, 4  ;;  %s210_s13 = scalar_lea.hbm %s327_s1, 128  ;;  %s17_s10 = int_to_ptr.vmem [resolvable:$true] %s16_s10 }
   0x2   :  { %p211_p0 = scmp.ne.s32.totalorder %s327_s1, %s210_s13  ;;  %p214_p1 = scmp.lt.u32.totalorder %s210_s13, %s327_s1 }
   0x4   :  { %p216_p2 = pnand %p214_p1, %p211_p0 }
   0x6   :  { %219 = shalt.err (!%p216_p2)
}
   0x7   :  { %s220_s18 = scalar_lea.vmem %s17_s10, 128  ;;  %p225_p4 = scmp.lt.s32.totalorder %s17_s10, %s17_s10 }
   0x8   :  { %p221_p3 = scmp.ne.s32.totalorder %s17_s10, %s220_s18  ;;  %p226_p5 = scmp.lt.s32.totalorder %s220_s18, %s220_s18 }
   0xa   :  { %p227_p6 = por %p226_p5, %p225_p4 }
   0xc   :  { %p228_p7 = pnand %p227_p6, %p221_p3 }
   0xe   :  { %231 = shalt.err (!%p228_p7)
}
   0xf   :  { %19 = dma.hbm_to_vmem [thread:$0]  %s327_s1, 128, %s17_s10, [#allocation3]  }
  0x10   :  { %232 = dma.done.wait [#allocation3], 128  }
  0x11   :  { %233 = vsyncadd [#allocation3], 4294967168  ;;  %v31_v0 = vld [vmem:[#allocation2] sm:$0xff]  ;;  %vm32_vm0 = vcmask 64512   ;;  %v24_v3 = vld [vmem:[%s326_s0 + $0x8] sm:$0xff]  ;;  %vm162_vm1 = vcmask 130048  }
  0x12   :  { %v23_v1 = vld [vmem:[%s326_s0] sm:$0xff]  ;;  %193 = vmatprep.subr.mxu0 %v31_v0  ;;  %207 = vmatprep.subr.mxu1 %v31_v0  ;;  %v28_v4 = vld [vmem:[%s326_s0 + $0x28] sm:$0xff]  ;;  %v25_v5 = vld [vmem:[%s326_s0 + $0x10] sm:$0xff] }
  0x13   :  { %v27_v2 = vld [vmem:[%s326_s0 + $0x20] sm:$0xff]  ;;  %194 = vmatpush3.msra.mxu0 %v31_v0  ;;  %208 = vmatpush3.msra.mxu1 %v31_v0  ;;  %v29_v6 = vld [vmem:[%s326_s0 + $0x30] sm:$0xff]  ;;  %v26_v7 = vld [vmem:[%s326_s0 + $0x18] sm:$0xff] }
  0x14   :  { %195 = vmatprep.mubr.msk.f32.mxu0 %vm32_vm0, %v23_v1  ;;  %201 = vmatprep.mubr.msk.f32.mxu1 %vm32_vm0, %v27_v2  ;;  %v30_v8 = vld [vmem:[%s326_s0 + $0x38] sm:$0xff] }
  0x15   :  { %196 = vmatmul.mubr.msk.f32.vlgmr.msra.gmra.mrb[0].mxu0 %vm32_vm0, %v24_v3  ;;  %202 = vmatmul.mubr.msk.f32.vlgmr.msra.gmra.mrb[0].mxu1 %vm32_vm0, %v28_v4 }
  0x16   :  { %198 = vmatprep.mubr.msk.f32.mxu0 %vm32_vm0, %v25_v5  ;;  %204 = vmatprep.mubr.msk.f32.mxu1 %vm32_vm0, %v29_v6 }
  0x19   :  { %199 = vmatmul.mubr.msk.f32.gmra.mrb[2].mxu0 %vm32_vm0, %v26_v7  ;;  %205 = vmatmul.mubr.msk.f32.gmra.mrb[2].mxu1 %vm32_vm0, %v30_v8 }
  0xe8   :  { %v197_v9 = vpop.f32.mrb[0].mxu0  ;;  %v203_v10 = vpop.f32.mrb[0].mxu1 }
  0xe9   :  { %164 = vst.msk [vmem:[%s328_s2 + $0x8] sm:$0xff] %vm162_vm1, %v197_v9  ;;  %168 = vst.msk [vmem:[%s328_s2 + $0x28] sm:$0xff] %vm162_vm1, %v203_v10  ;;  %v123_v11 = vpop.f32.mrb[1].mxu0  ;;  %v143_v12 = vpop.f32.mrb[1].mxu1 }
  0xea   :  { %163 = vst.msk [vmem:[%s328_s2] sm:$0xff] %vm162_vm1, %v123_v11  ;;  %167 = vst.msk [vmem:[%s328_s2 + $0x20] sm:$0xff] %vm162_vm1, %v143_v12 }
  0xec   :  { %v200_v13 = vpop.f32.mrb[2].mxu0  ;;  %v206_v14 = vpop.f32.mrb[2].mxu1 }
  0xed   :  { %166 = vst.msk [vmem:[%s328_s2 + $0x18] sm:$0xff] %vm162_vm1, %v200_v13  ;;  %170 = vst.msk [vmem:[%s328_s2 + $0x38] sm:$0xff] %vm162_vm1, %v206_v14  ;;  %v133_v15 = vpop.f32.mrb[3].mxu0  ;;  %v153_v16 = vpop.f32.mrb[3].mxu1 }
  0xee   :  { %165 = vst.msk [vmem:[%s328_s2 + $0x10] sm:$0xff] %vm162_vm1, %v133_v15  ;;  %169 = vst.msk [vmem:[%s328_s2 + $0x30] sm:$0xff] %vm162_vm1, %v153_v16 }
  0xef   :  { %175 = vsyncpa [#allocation3], 1 }

// kernel: attention_block_forward.8
= control target key start
LH: loop header
LB: loop body
LE: loop exit
PB: predicated region body
PF: predicated region fallthrough
CT: control target
= control target key end

     0   :  { %vm28_vm0 = vcmask 64512   ;;  %vm222_vm1 = vcmask 130048   ;;  %s450_s1 = inlined_call_operand.vmem [shape: f32[8,16], index: 1, kind: input, shape index: {}]   ;;  %s451_s0 = inlined_call_operand.vmem [shape: f32[128,8], index: 0, kind: input, shape index: {}]   ;;  %s452_s2 = inlined_call_operand.vmem [shape: f32[128,16], index: 2, kind: output, shape index: {}]  }
   0x1   :  { %v27_v0 = vld [vmem:[%s450_s1] sm:$0xff]  ;;  %v12_v3 = vld [vmem:[%s451_s0 + $0x8] sm:$0xff]  ;;  %v13_v5 = vld [vmem:[%s451_s0 + $0x10] sm:$0xff] }
   0x2   :  { %v11_v1 = vld [vmem:[%s451_s0] sm:$0xff]  ;;  %276 = vmatprep.subr.mxu0 %v27_v0  ;;  %302 = vmatprep.subr.mxu1 %v27_v0  ;;  %v20_v4 = vld [vmem:[%s451_s0 + $0x48] sm:$0xff]  ;;  %v21_v6 = vld [vmem:[%s451_s0 + $0x50] sm:$0xff] }
   0x3   :  { %v19_v2 = vld [vmem:[%s451_s0 + $0x40] sm:$0xff]  ;;  %277 = vmatpush3.msra.mxu0 %v27_v0  ;;  %303 = vmatpush3.msra.mxu1 %v27_v0  ;;  %v14_v7 = vld [vmem:[%s451_s0 + $0x18] sm:$0xff]  ;;  %v16_v11 = vld [vmem:[%s451_s0 + $0x28] sm:$0xff] }
   0x4   :  { %278 = vmatprep.mubr.msk.f32.mxu0 %vm28_vm0, %v11_v1  ;;  %290 = vmatprep.mubr.msk.f32.mxu1 %vm28_vm0, %v19_v2  ;;  %v22_v8 = vld [vmem:[%s451_s0 + $0x58] sm:$0xff]  ;;  %v15_v9 = vld [vmem:[%s451_s0 + $0x20] sm:$0xff]  ;;  %v24_v12 = vld [vmem:[%s451_s0 + $0x68] sm:$0xff] }
   0x5   :  { %279 = vmatmul.mubr.msk.f32.vlgmr.msra.gmra.mrb[0].mxu0 %vm28_vm0, %v12_v3  ;;  %291 = vmatmul.mubr.msk.f32.vlgmr.msra.gmra.mrb[0].mxu1 %vm28_vm0, %v20_v4  ;;  %v23_v10 = vld [vmem:[%s451_s0 + $0x60] sm:$0xff]  ;;  %v17_v13 = vld [vmem:[%s451_s0 + $0x30] sm:$0xff]  ;;  %v18_v15 = vld [vmem:[%s451_s0 + $0x38] sm:$0xff] }
   0x6   :  { %281 = vmatprep.mubr.msk.f32.mxu0 %vm28_vm0, %v13_v5  ;;  %293 = vmatprep.mubr.msk.f32.mxu1 %vm28_vm0, %v21_v6  ;;  %v25_v14 = vld [vmem:[%s451_s0 + $0x70] sm:$0xff]  ;;  %v26_v16 = vld [vmem:[%s451_s0 + $0x78] sm:$0xff] }
   0x9   :  { %282 = vmatmul.mubr.msk.f32.gmra.mrb[2].mxu0 %vm28_vm0, %v14_v7  ;;  %294 = vmatmul.mubr.msk.f32.gmra.mrb[2].mxu1 %vm28_vm0, %v22_v8 }
   0xa   :  { %284 = vmatprep.mubr.msk.f32.mxu0 %vm28_vm0, %v15_v9  ;;  %296 = vmatprep.mubr.msk.f32.mxu1 %vm28_vm0, %v23_v10 }
   0xd   :  { %285 = vmatmul.mubr.msk.f32.gmra.mrb[4].mxu0 %vm28_vm0, %v16_v11  ;;  %297 = vmatmul.mubr.msk.f32.gmra.mrb[4].mxu1 %vm28_vm0, %v24_v12 }
   0xe   :  { %287 = vmatprep.mubr.msk.f32.mxu0 %vm28_vm0, %v17_v13  ;;  %299 = vmatprep.mubr.msk.f32.mxu1 %vm28_vm0, %v25_v14 }
  0x11   :  { %288 = vmatmul.mubr.msk.f32.gmra.mrb[6].mxu0 %vm28_vm0, %v18_v15  ;;  %300 = vmatmul.mubr.msk.f32.gmra.mrb[6].mxu1 %vm28_vm0, %v26_v16 }
  0xd8   :  { %v280_v17 = vpop.f32.mrb[0].mxu0  ;;  %v292_v18 = vpop.f32.mrb[0].mxu1 }
  0xd9   :  { %224 = vst.msk [vmem:[%s452_s2 + $0x8] sm:$0xff] %vm222_vm1, %v280_v17  ;;  %232 = vst.msk [vmem:[%s452_s2 + $0x48] sm:$0xff] %vm222_vm1, %v292_v18  ;;  %v143_v19 = vpop.f32.mrb[1].mxu0  ;;  %v183_v20 = vpop.f32.mrb[1].mxu1 }
  0xda   :  { %223 = vst.msk [vmem:[%s452_s2] sm:$0xff] %vm222_vm1, %v143_v19  ;;  %231 = vst.msk [vmem:[%s452_s2 + $0x40] sm:$0xff] %vm222_vm1, %v183_v20 }
  0xdc   :  { %v283_v21 = vpop.f32.mrb[2].mxu0  ;;  %v295_v22 = vpop.f32.mrb[2].mxu1 }
  0xdd   :  { %226 = vst.msk [vmem:[%s452_s2 + $0x18] sm:$0xff] %vm222_vm1, %v283_v21  ;;  %234 = vst.msk [vmem:[%s452_s2 + $0x58] sm:$0xff] %vm222_vm1, %v295_v22  ;;  %v153_v23 = vpop.f32.mrb[3].mxu0  ;;  %v193_v24 = vpop.f32.mrb[3].mxu1 }
  0xde   :  { %225 = vst.msk [vmem:[%s452_s2 + $0x10] sm:$0xff] %vm222_vm1, %v153_v23  ;;  %233 = vst.msk [vmem:[%s452_s2 + $0x50] sm:$0xff] %vm222_vm1, %v193_v24 }
  0xe0   :  { %v286_v25 = vpop.f32.mrb[4].mxu0  ;;  %v298_v26 = vpop.f32.mrb[4].mxu1 }
  0xe1   :  { %228 = vst.msk [vmem:[%s452_s2 + $0x28] sm:$0xff] %vm222_vm1, %v286_v25  ;;  %236 = vst.msk [vmem:[%s452_s2 + $0x68] sm:$0xff] %vm222_vm1, %v298_v26  ;;  %v163_v27 = vpop.f32.mrb[5].mxu0  ;;  %v203_v28 = vpop.f32.mrb[5].mxu1 }
  0xe2   :  { %227 = vst.msk [vmem:[%s452_s2 + $0x20] sm:$0xff] %vm222_vm1, %v163_v27  ;;  %235 = vst.msk [vmem:[%s452_s2 + $0x60] sm:$0xff] %vm222_vm1, %v203_v28 }
  0xe4   :  { %v289_v29 = vpop.f32.mrb[6].mxu0  ;;  %v301_v30 = vpop.f32.mrb[6].mxu1 }
  0xe5   :  { %230 = vst.msk [vmem:[%s452_s2 + $0x38] sm:$0xff] %vm222_vm1, %v289_v29  ;;  %238 = vst.msk [vmem:[%s452_s2 + $0x78] sm:$0xff] %vm222_vm1, %v301_v30  ;;  %v173_v31 = vpop.f32.mrb[7].mxu0  ;;  %v213_v32 = vpop.f32.mrb[7].mxu1 }
  0xe6   :  { %229 = vst.msk [vmem:[%s452_s2 + $0x30] sm:$0xff] %vm222_vm1, %v173_v31  ;;  %237 = vst.msk [vmem:[%s452_s2 + $0x70] sm:$0xff] %vm222_vm1, %v213_v32 }

// kernel: attention_block_forward.10
= control target key start
LH: loop header
LB: loop body
LE: loop exit
PB: predicated region body
PF: predicated region fallthrough
CT: control target
= control target key end

     0   :  { %vm43_vm0 = vcmask 1043456   ;;  %v444_v2 = vmov 0.0   ;;  %v445_v5 = vmov 0   ;;  %vm39_vm1 = vcmask 31744   ;;  %s558_s0 = inlined_call_operand.vmem [shape: f32[4,512], index: 0, kind: input, shape index: {}]   ;;  %s559_s2 = inlined_call_operand.vmem [shape: f32[4,4], index: 2, kind: input, shape index: {}]   ;;  %s560_s4 = inlined_call_operand.vmem [shape: f32[4,1], index: 4, kind: input, shape index: {}]   ;;  %s561_s5 = inlined_call_operand.vmem [shape: f32[4,1], index: 5, kind: input, shape index: {}]   ;;  %s562_s1 = inlined_call_operand.vmem [shape: f32[4,512], index: 1, kind: input, shape index: {}]   ;;  %s563_s3 = inlined_call_operand.vmem [shape: f32[4,4], index: 3, kind: input, shape index: {}]   ;;  %s564_s6 = inlined_call_operand.vmem [shape: f32[4,1], index: 6, kind: output, shape index: {0}]   ;;  %s565_s7 = inlined_call_operand.vmem [shape: f32[4,1], index: 7, kind: output, shape index: {1}]  }
   0x1   :  { %v33_v0 = vld [vmem:[%s558_s0] sm:$0xff]  ;;  %v34_v1 = vld [vmem:[%s558_s0 + $0x8] sm:$0xff]  ;;  %116 = vmatprep.mubr.f32.mxu0 %v444_v2  ;;  %187 = vmatprep.mubr.f32.mxu1 %v444_v2  ;;  %vm29_vm2 = vcmask 3072  }
   0x2   :  { %v37_v3 = vcombine.high %v33_v0, %v33_v0  ;;  %v38_v4 = vcombine.high %v34_v1, %v34_v1  ;;  %439 = vset.pattern.permute.xlu0 %v445_v5  ;;  %v194_v6 = vld [vmem:[%s560_s4] sm:$0xf]  ;;  %v215_v11 = vld [vmem:[%s562_s1 + $0x8] sm:$0xff]  ;;  %30 = vst.msk [vmem:[%s564_s6] sm:$0xf] %vm29_vm2, %v444_v2 }
   0x3   :  { %v32_v7 = vld [vmem:[%s559_s2] sm:$0xf]  ;;  %197 = vperm.xlu0 %439, %v194_v6   ;;  %v219_v22 = vcombine.high %v215_v11, %v215_v11  ;;  %31 = vst.msk [vmem:[%s565_s7] sm:$0xf] %vm29_vm2, %v444_v2 }
   0x4   :  { %425 = vmatprep.subr.msk.mxu0 %vm43_vm0, %v37_v3  ;;  %428 = vmatprep.subr.msk.mxu1 %vm43_vm0, %v38_v4  ;;  %v204_v8 = vld [vmem:[%s561_s5] sm:$0xf] }
   0x5   :  { %426 = vmatpush1.msk.msra.mxu0 %vm43_vm0, %v33_v0  ;;  %429 = vmatpush1.msk.msra.mxu1 %vm43_vm0, %v34_v1  ;;  %v214_v10 = vld [vmem:[%s562_s1] sm:$0xff] }
   0x6   :  { %427 = vmatmul.mubr.msk.f32.vlgmr.msra.gmra.mrb[0].mxu0 %vm39_vm1, %v32_v7  ;;  %430 = vmatmul.mubr.msk.f32.vlgmr.msra.gmra.mrb[0].mxu1 %vm39_vm1, %v32_v7  ;;  %v218_v20 = vcombine.high %v214_v10, %v214_v10  ;;  %v230_v35 = vld [vmem:[%s563_s3] sm:$0xf] }
   0x7   :  { %207 = vperm.xlu0 %439, %v204_v8   ;;  %310 = vmatprep.mubr.f32.mxu0 %v444_v2 }
   0x8   :  { %381 = vmatprep.mubr.f32.mxu1 %v444_v2 }
   0x9   :  { %v388_v58 = vld [vmem:[%s564_s6] sm:$0xf] }
   0xa   :  { %v401_v61 = vld [vmem:[%s565_s7] sm:$0xf] }
  0x82   :  { %v198_v9 = vpop.permute.xlu0 %197 }
  0x86   :  { %v208_v18 = vpop.permute.xlu0 %207 }
  0xd9   :  { %v118_v12 = vpop.f32.mrb[0].mxu0  ;;  %v189_v13 = vpop.f32.mrb[0].mxu1 }
  0xda   :  { %v200_v14 = vmul.f32 %v198_v9, %v118_v12  ;;  %v202_v15 = vmul.f32 %v198_v9, %v189_v13  ;;  %v120_v16 = vpop.f32.mrb[1].mxu0  ;;  %v191_v17 = vpop.f32.mrb[1].mxu1 }
  0xdb   :  { %v201_v19 = vmul.f32 %v198_v9, %v120_v16  ;;  %v203_v21 = vmul.f32 %v198_v9, %v191_v17 }
  0xdc   :  { %v210_v23 = vadd.f32 %v208_v18, %v200_v14  ;;  %v212_v24 = vadd.f32 %v208_v18, %v202_v15 }
  0xdd   :  { %v211_v25 = vadd.f32 %v208_v18, %v201_v19  ;;  %v213_v26 = vadd.f32 %v208_v18, %v203_v21 }
  0xde   :  { %v222_v27 = vadd.f32 %v214_v10, %v210_v23  ;;  %v224_v28 = vadd.f32 %v215_v11, %v212_v24 }
  0xdf   :  { %v223_v29 = vadd.f32 %v218_v20, %v211_v25  ;;  %v225_v30 = vadd.f32 %v219_v22, %v213_v26 }
  0xe0   :  { %v226_v33 = vmax.f32 %v222_v27, 0.0  ;;  %v228_v34 = vmax.f32 %v224_v28, 0.0 }
  0xe1   :  { %v227_v31 = vmax.f32 %v223_v29, 0.0  ;;  %v229_v32 = vmax.f32 %v225_v30, 0.0 }
  0xe3   :  { %431 = vmatprep.subr.msk.mxu0 %vm43_vm0, %v227_v31  ;;  %434 = vmatprep.subr.msk.mxu1 %vm43_vm0, %v229_v32 }
  0xe4   :  { %432 = vmatpush1.msk.msra.mxu0 %vm43_vm0, %v226_v33  ;;  %435 = vmatpush1.msk.msra.mxu1 %vm43_vm0, %v228_v34 }
  0xe5   :  { %433 = vmatmul.mubr.msk.f32.vlgmr.msra.gmra.mrb[2].mxu0 %vm39_vm1, %v230_v35  ;;  %436 = vmatmul.mubr.msk.f32.vlgmr.msra.gmra.mrb[2].mxu1 %vm39_vm1, %v230_v35 }
 0x1b8   :  { %v312_v36 = vpop.f32.mrb[2].mxu0  ;;  %v383_v37 = vpop.f32.mrb[2].mxu1 }
 0x1b9   :  { %v389_v38 = vsel %vm43_vm0, %v312_v36, 0.0  ;;  %v402_v39 = vmul.f32 %v312_v36, %v312_v36  ;;  %v314_v40 = vpop.f32.mrb[3].mxu0  ;;  %v404_v41 = vmul.f32 %v383_v37, %v383_v37  ;;  %v385_v42 = vpop.f32.mrb[3].mxu1  ;;  %v392_v45 = vsel %vm43_vm0, %v383_v37, 0.0 }
 0x1ba   :  { %v390_v43 = vsel %vm43_vm0, %v314_v40, 0.0  ;;  %v403_v44 = vmul.f32 %v314_v40, %v314_v40  ;;  %v405_v50 = vmul.f32 %v385_v42, %v385_v42  ;;  %v394_v53 = vsel %vm43_vm0, %v385_v42, 0.0 }
 0x1bb   :  { %v406_v46 = vsel %vm43_vm0, %v402_v39, 0.0  ;;  %v391_v47 = vadd.f32 %v390_v43, %v389_v38  ;;  %v409_v49 = vsel %vm43_vm0, %v404_v41, 0.0 }
 0x1bc   :  { %v407_v48 = vsel %vm43_vm0, %v403_v44, 0.0  ;;  %v411_v56 = vsel %vm43_vm0, %v405_v50, 0.0 }
 0x1bd   :  { %v408_v51 = vadd.f32 %v407_v48, %v406_v46  ;;  %v393_v52 = vadd.f32 %v392_v45, %v391_v47 }
 0x1bf   :  { %v395_v54 = vadd.f32 %v394_v53, %v393_v52  ;;  %v410_v55 = vadd.f32 %v409_v49, %v408_v51 }
 0x1c1   :  { %396 = vadd.xlane.f32.xlu1 %v395_v54  ;;  %v412_v57 = vadd.f32 %v411_v56, %v410_v55 }
 0x1c5   :  { %413 = vadd.xlane.f32.xlu1 %v412_v57 }
 0x24e   :  { %v397_v59 = vpop.xlane.xlu1 %396 }
 0x24f   :  { %v398_v60 = vadd.f32 %v397_v59, %v388_v58 }
 0x251   :  { %400 = vst.msk [vmem:[%s564_s6] sm:$0xf] %vm29_vm2, %v398_v60 }
 0x252   :  { %v414_v62 = vpop.xlane.xlu1 %413 }
 0x253   :  { %v415_v63 = vadd.f32 %v414_v62, %v401_v61 }
 0x255   :  { %416 = vst.msk [vmem:[%s565_s7] sm:$0xf] %vm29_vm2, %v415_v63 }

// kernel: attention_block_forward.11
= control target key start
LH: loop header
LB: loop body
LE: loop exit
PB: predicated region body
PF: predicated region fallthrough
CT: control target
= control target key end

     0   :  { %vm40_vm0 = vcmask 1043456   ;;  %v485_v2 = vmov 0.0   ;;  %v486_v5 = vmov 0   ;;  %vm36_vm1 = vcmask 31744   ;;  %s592_s0 = inlined_call_operand.vmem [shape: f32[4,512], index: 0, kind: input, shape index: {}]   ;;  %s593_s2 = inlined_call_operand.vmem [shape: f32[4,4], index: 2, kind: input, shape index: {}]   ;;  %s594_s4 = inlined_call_operand.vmem [shape: f32[4,1], index: 4, kind: input, shape index: {}]   ;;  %s595_s5 = inlined_call_operand.vmem [shape: f32[4,1], index: 5, kind: input, shape index: {}]   ;;  %s596_s6 = inlined_call_operand.vmem [shape: f32[4,1], index: 6, kind: input, shape index: {}]   ;;  %s597_s7 = inlined_call_operand.vmem [shape: f32[4,1], index: 7, kind: input, shape index: {}]   ;;  %s598_s1 = inlined_call_operand.vmem [shape: f32[4,512], index: 1, kind: input, shape index: {}]   ;;  %s599_s3 = inlined_call_operand.vmem [shape: f32[4,4], index: 3, kind: input, shape index: {}]   ;;  %s600_s8 = inlined_call_operand.vmem [shape: f32[4,512], index: 8, kind: output, shape index: {}]  }
   0x1   :  { %v535_v0 = vld [vmem:[%s592_s0] sm:$0xff]  ;;  %v540_v1 = vld [vmem:[%s592_s0 + $0x8] sm:$0xff]  ;;  %113 = vmatprep.mubr.f32.mxu0 %v485_v2  ;;  %184 = vmatprep.mubr.f32.mxu1 %v485_v2 }
   0x2   :  { %v34_v3 = vcombine.high %v535_v0, %v535_v0  ;;  %v35_v4 = vcombine.high %v540_v1, %v540_v1  ;;  %463 = vset.pattern.permute.xlu0 %v486_v5  ;;  %v191_v6 = vld [vmem:[%s594_s4] sm:$0xf]  ;;  %464 = vset.pattern.permute.xlu1 %v486_v5  ;;  %v212_v13 = vld [vmem:[%s598_s1 + $0x8] sm:$0xff] }
   0x3   :  { %v31_v7 = vld [vmem:[%s593_s2] sm:$0xf]  ;;  %194 = vperm.xlu0 %463, %v191_v6   ;;  %v216_v24 = vcombine.high %v212_v13, %v212_v13 }
   0x4   :  { %445 = vmatprep.subr.msk.mxu0 %vm40_vm0, %v34_v3  ;;  %448 = vmatprep.subr.msk.mxu1 %vm40_vm0, %v35_v4  ;;  %v201_v8 = vld [vmem:[%s595_s5] sm:$0xf] }
   0x5   :  { %446 = vmatpush1.msk.msra.mxu0 %vm40_vm0, %v535_v0  ;;  %449 = vmatpush1.msk.msra.mxu1 %vm40_vm0, %v540_v1  ;;  %v385_v9 = vld [vmem:[%s596_s6] sm:$0xf] }
   0x6   :  { %447 = vmatmul.mubr.msk.f32.vlgmr.msra.gmra.mrb[0].mxu0 %vm36_vm1, %v31_v7  ;;  %450 = vmatmul.mubr.msk.f32.vlgmr.msra.gmra.mrb[0].mxu1 %vm36_vm1, %v31_v7  ;;  %v395_v10 = vld [vmem:[%s597_s7] sm:$0xf] }
   0x7   :  { %204 = vperm.xlu0 %463, %v201_v8   ;;  %307 = vmatprep.mubr.f32.mxu0 %v485_v2  ;;  %v211_v12 = vld [vmem:[%s598_s1] sm:$0xff] }
   0x8   :  { %378 = vmatprep.mubr.f32.mxu1 %v485_v2  ;;  %388 = vperm.xlu1 %464, %v385_v9   ;;  %v215_v22 = vcombine.high %v211_v12, %v211_v12  ;;  %v227_v37 = vld [vmem:[%s599_s3] sm:$0xf] }
   0xc   :  { %398 = vperm.xlu1 %464, %v395_v10  }
  0x82   :  { %v195_v11 = vpop.permute.xlu0 %194 }
  0x86   :  { %v205_v20 = vpop.permute.xlu0 %204 }
  0x87   :  { %v389_v38 = vpop.permute.xlu1 %388 }
  0x8b   :  { %v399_v47 = vpop.permute.xlu1 %398 }
  0xd9   :  { %v115_v14 = vpop.f32.mrb[0].mxu0  ;;  %v186_v15 = vpop.f32.mrb[0].mxu1 }
  0xda   :  { %v197_v16 = vmul.f32 %v195_v11, %v115_v14  ;;  %v199_v17 = vmul.f32 %v195_v11, %v186_v15  ;;  %v117_v18 = vpop.f32.mrb[1].mxu0  ;;  %v188_v19 = vpop.f32.mrb[1].mxu1 }
  0xdb   :  { %v198_v21 = vmul.f32 %v195_v11, %v117_v18  ;;  %v200_v23 = vmul.f32 %v195_v11, %v188_v19 }
  0xdc   :  { %v207_v25 = vadd.f32 %v205_v20, %v197_v16  ;;  %v209_v26 = vadd.f32 %v205_v20, %v199_v17 }
  0xdd   :  { %v208_v27 = vadd.f32 %v205_v20, %v198_v21  ;;  %v210_v28 = vadd.f32 %v205_v20, %v200_v23 }
  0xde   :  { %v219_v29 = vadd.f32 %v211_v12, %v207_v25  ;;  %v221_v30 = vadd.f32 %v212_v13, %v209_v26 }
  0xdf   :  { %v220_v31 = vadd.f32 %v215_v22, %v208_v27  ;;  %v222_v32 = vadd.f32 %v216_v24, %v210_v28 }
  0xe0   :  { %v223_v35 = vmax.f32 %v219_v29, 0.0  ;;  %v225_v36 = vmax.f32 %v221_v30, 0.0 }
  0xe1   :  { %v224_v33 = vmax.f32 %v220_v31, 0.0  ;;  %v226_v34 = vmax.f32 %v222_v32, 0.0 }
  0xe3   :  { %451 = vmatprep.subr.msk.mxu0 %vm40_vm0, %v224_v33  ;;  %454 = vmatprep.subr.msk.mxu1 %vm40_vm0, %v226_v34 }
  0xe4   :  { %452 = vmatpush1.msk.msra.mxu0 %vm40_vm0, %v223_v35  ;;  %455 = vmatpush1.msk.msra.mxu1 %vm40_vm0, %v225_v36 }
  0xe5   :  { %453 = vmatmul.mubr.msk.f32.vlgmr.msra.gmra.mrb[2].mxu0 %vm36_vm1, %v227_v37  ;;  %456 = vmatmul.mubr.msk.f32.vlgmr.msra.gmra.mrb[2].mxu1 %vm36_vm1, %v227_v37 }
 0x1b8   :  { %v309_v39 = vpop.f32.mrb[2].mxu0  ;;  %v380_v40 = vpop.f32.mrb[2].mxu1 }
 0x1b9   :  { %v391_v41 = vmul.f32 %v389_v38, %v309_v39  ;;  %v393_v42 = vmul.f32 %v389_v38, %v380_v40  ;;  %v311_v43 = vpop.f32.mrb[3].mxu0  ;;  %v382_v44 = vpop.f32.mrb[3].mxu1 }
 0x1ba   :  { %v392_v45 = vmul.f32 %v389_v38, %v311_v43  ;;  %v394_v46 = vmul.f32 %v389_v38, %v382_v44 }
 0x1bb   :  { %v401_v48 = vadd.f32 %v399_v47, %v391_v41  ;;  %v403_v49 = vadd.f32 %v399_v47, %v393_v42 }
 0x1bc   :  { %v402_v50 = vadd.f32 %v399_v47, %v392_v45  ;;  %v404_v51 = vadd.f32 %v399_v47, %v394_v46 }
 0x1bd   :  { %v457_v52 = vmul.f32 -1.442695, %v401_v48  ;;  %v459_v53 = vmul.f32 -1.442695, %v403_v49 }
 0x1be   :  { %v458_v54 = vmul.f32 -1.442695, %v402_v50  ;;  %v460_v55 = vmul.f32 -1.442695, %v404_v51 }
 0x1bf   :  { %469 = vpow2.f32 %v457_v52 }
 0x1c0   :  { %471 = vpow2.f32 %v458_v54 }
 0x1c1   :  { %473 = vpow2.f32 %v459_v53 }
 0x1c2   :  { %475 = vpow2.f32 %v460_v55 }
 0x1c9   :  { %v470_v56 = vpop.eup %469 }
 0x1ca   :  { %v472_v57 = vpop.eup %471  ;;  %v417_v58 = vadd.f32 1.0, %v470_v56 }
 0x1cb   :  { %v474_v59 = vpop.eup %473  ;;  %v418_v60 = vadd.f32 1.0, %v472_v57 }
 0x1cc   :  { %v476_v61 = vpop.eup %475  ;;  %v419_v62 = vadd.f32 1.0, %v474_v59  ;;  %477 = vrcp.f32 %v417_v58 }
 0x1cd   :  { %v420_v63 = vadd.f32 1.0, %v476_v61  ;;  %479 = vrcp.f32 %v418_v60 }
 0x1ce   :  { %481 = vrcp.f32 %v419_v62 }
 0x1cf   :  { %483 = vrcp.f32 %v420_v63 }
 0x1d6   :  { %v478_v2 = vpop.eup %477 }
 0x1d7   :  { %v480_v3 = vpop.eup %479 }
 0x1d8   :  { %v482_v4 = vpop.eup %481  ;;  %v433_v5 = vcombine.low %v478_v2, %v480_v3 }
 0x1d9   :  { %v484_v6 = vpop.eup %483 }
 0x1da   :  { %v434_v7 = vcombine.low %v482_v4, %v484_v6  ;;  %v437_v8 = vmul.f32 %v433_v5, %v535_v0 }
 0x1dc   :  { %v438_v9 = vmul.f32 %v434_v7, %v540_v1  ;;  %439 = vst [vmem:[%s600_s8] sm:$0xff] %v437_v8 }
 0x1de   :  { %440 = vst [vmem:[%s600_s8 + $0x8] sm:$0xff] %v438_v9 }

</bundles_post_ra>
